<compile_context>
chip_gen: v6e
topology: v6e:2x2x1
jax: 0.10.0
libtpu: 0.0.40
codegen_flags: <defaults>
</compile_context>

<pallas_src>
import jax
import jax.numpy as jnp
from jax.experimental import pallas as pl
from jax.experimental.pallas import tpu as pltpu


def _point_decoder_kernel(feat_ref, w1_ref, b1_ref, w2_ref, b2_ref, out_ref):
    # fc1: (Bp, 512) @ (512, n_points) + b1, then LeakyReLU(0.01).
    # Recomputed per N-tile: feat/w1/b1 are whole-array VMEM residents (no re-DMA) and the
    # tiny extra MXU work hides under the per-tile w2 DMA, so the grid axis stays "parallel".
    h = jnp.dot(feat_ref[...], w1_ref[...], preferred_element_type=jnp.float32)
    h = h + b1_ref[...]
    h = jnp.where(h > 0, h, 0.01 * h)  # PyTorch LeakyReLU default negative_slope

    # fc2 (one N-tile): (Bp, n_points) @ (n_points, TN) + b2, then Tanh.
    y = jnp.dot(h.astype(w2_ref.dtype), w2_ref[...],
                preferred_element_type=jnp.float32)
    y = y + b2_ref[...]
    out_ref[...] = jnp.tanh(y)


def _vmem_capacity_bytes():
    """Per-core VMEM capacity; conservative fallback (v7x = 64 MiB) if unavailable."""
    try:
        return int(pltpu.get_tpu_info().vmem_capacity_bytes)
    except Exception:
        return 64 << 20


def _plan_tiling(B_pad, F, n_points, out_dim):
    """Pick the fc2 output tile tn and a consistent vmem_limit from one budget number."""
    cap = _vmem_capacity_bytes()
    # ~56 MiB on v7x (64 MiB physical), 96 MiB on v5e/v6e (128 MiB physical).
    budget = min(cap - (8 << 20), 96 << 20)

    # Single-buffered residents (whole-array VMEM): feat (bf16), w1 (bf16), b1 (f32).
    resident = B_pad * F * 2 + F * n_points * 2 + n_points * 4
    headroom = 2 << 20  # compiler-internal scratch, semaphores, etc.

    def vmem_needed(tn):
        # Double-buffered streamed tiles: w2 (bf16), b2 (f32), out (f32).
        streamed = n_points * tn * 2 + tn * 4 + B_pad * tn * 4
        return resident + 2 * streamed + headroom

    candidates = [t for t in range(128, out_dim + 1, 128) if out_dim % t == 0]
    fitting = [t for t in candidates if vmem_needed(t) <= budget]
    if not fitting:
        # TODO(synk): stream w1 / K-tile fc2 with an f32 accumulator scratch for very
        #             large n_points where resident w1 alone exceeds the VMEM budget.
        raise NotImplementedError(
            f"n_points={n_points}: resident-w1 plan does not fit VMEM budget {budget} bytes")

    even_multi = [t for t in fitting if (out_dim // t) >= 2 and (out_dim // t) % 2 == 0]
    multi = [t for t in fitting if (out_dim // t) >= 2]
    tn = max(even_multi or multi or fitting)

    vmem_limit = int(min(max(vmem_needed(tn) + (8 << 20), 32 << 20), budget))
    return tn, vmem_limit


def single_view_to_3d_point(encoded_feat, w1, b1, w2, b2, n_points, tn=None):
    """Forward pass of SingleViewto3D for args.type='point', args.load_feat=True.

    encoded_feat: (B, 512) float32
    w1: (512, n_points), b1: (n_points,)
    w2: (n_points, 3*n_points), b2: (3*n_points,)
    returns pointclouds_pred: (B, n_points, 3) float32
    """
    B, F = encoded_feat.shape
    out_dim = 3 * n_points
    assert F == 512, "Linear(512, n_point) fixes the feature dim at 512"
    assert n_points % 128 == 0, "keep n_points lane-aligned (pad externally otherwise)"

    # Pad batch to a multiple of 16 (bf16 packs 16 sublanes per vreg; f32 out stays 8-aligned).
    B_pad = ((B + 15) // 16) * 16

    planned_tn, vmem_limit = _plan_tiling(B_pad, F, n_points, out_dim)
    if tn is None:
        tn = planned_tn
    assert tn % 128 == 0 and out_dim % tn == 0
    num_n_tiles = out_dim // tn

    feat = encoded_feat.astype(jnp.bfloat16)
    if B_pad != B:
        feat = jnp.pad(feat, ((0, B_pad - B), (0, 0)))

    # bf16 weights halve HBM traffic (kernel is weight-streaming bound); f32 biases.
    w1_bf = w1.astype(jnp.bfloat16)
    w2_bf = w2.astype(jnp.bfloat16)
    b1_2d = b1.reshape(1, n_points).astype(jnp.float32)
    b2_2d = b2.reshape(1, out_dim).astype(jnp.float32)

    # Grid-invariant operands live whole in VMEM (single-buffered); only w2/b2/out stream.
    vmem_whole = pl.BlockSpec(memory_space=pltpu.MemorySpace.VMEM)

    flat = pl.pallas_call(
        _point_decoder_kernel,
        out_shape=jax.ShapeDtypeStruct((B_pad, out_dim), jnp.float32),
        grid_spec=pltpu.PrefetchScalarGridSpec(
            num_scalar_prefetch=0,
            grid=(num_n_tiles,),
            in_specs=[
                vmem_whole,                                      # feat (resident, 1 buffer)
                vmem_whole,                                      # w1   (resident, 1 buffer)
                vmem_whole,                                      # b1   (resident, 1 buffer)
                pl.BlockSpec((n_points, tn), lambda j: (0, j)),  # w2 N-tile (streamed)
                pl.BlockSpec((1, tn), lambda j: (0, j)),         # b2 N-tile (streamed)
            ],
            out_specs=pl.BlockSpec((B_pad, tn), lambda j: (0, j)),  # out N-tile (lane-dense)
        ),
        compiler_params=pltpu.CompilerParams(
            dimension_semantics=("parallel",),   # independent output tiles; v7x megacore
            vmem_limit_bytes=vmem_limit),
    )(feat, w1_bf, b1_2d, w2_bf, b2_2d)

    # Drop batch padding; ReshapeLayer((-1, n_points, 3)) is pure metadata.
    return flat[:B].reshape(B, n_points, 3)


def _reference_bf16(encoded_feat, w1, b1, w2, b2, n_points):
    # Same bf16 weight quantization as the kernel so this comparison isolates kernel bugs.
    f = encoded_feat.astype(jnp.bfloat16)
    h = jnp.dot(f, w1.astype(jnp.bfloat16), preferred_element_type=jnp.float32)
    h = h + b1.astype(jnp.float32)
    h = jnp.where(h > 0, h, 0.01 * h)
    y = jnp.dot(h.astype(jnp.bfloat16), w2.astype(jnp.bfloat16),
                preferred_element_type=jnp.float32)
    y = y + b2.astype(jnp.float32)
    return jnp.tanh(y).reshape(encoded_feat.shape[0], n_points, 3)


def _reference_f32(encoded_feat, w1, b1, w2, b2, n_points):
    # Pure f32 reference = the original PyTorch module's math; bounds bf16 quantization drift.
    h = jnp.dot(encoded_feat, w1) + b1
    h = jnp.where(h > 0, h, 0.01 * h)
    y = jnp.dot(h, w2) + b2
    return jnp.tanh(y).reshape(encoded_feat.shape[0], n_points, 3)


if __name__ == "__main__":
    # Small deterministic shapes consistent with the module:
    # Linear(512, n_point) fixes the feature dim at 512; pick n_points=128 (lane-aligned).
    B = 2
    FEAT = 512
    N_POINTS = 128

    key = jax.random.PRNGKey(0)
    k_feat, k_w1, k_b1, k_w2, k_b2 = jax.random.split(key, 5)

    # encoded_feat plays the role of `images` when args.load_feat=True.
    images = jax.random.normal(k_feat, (B, FEAT), dtype=jnp.float32)

    # Deterministic parameter init (PyTorch Linear stores (out, in); we keep (in, out)).
    w1 = jax.random.normal(k_w1, (FEAT, N_POINTS), dtype=jnp.float32) * 0.02
    b1 = jax.random.normal(k_b1, (N_POINTS,), dtype=jnp.float32) * 0.02
    w2 = jax.random.normal(k_w2, (N_POINTS, 3 * N_POINTS), dtype=jnp.float32) * 0.02
    b2 = jax.random.normal(k_b2, (3 * N_POINTS,), dtype=jnp.float32) * 0.02

    # Planner picks tn (=128 here -> 3-step grid): exercises the streamed w2 pipeline.
    pointclouds_pred = single_view_to_3d_point(images, w1, b1, w2, b2, N_POINTS)
    pointclouds_pred = jax.block_until_ready(pointclouds_pred)
    assert pointclouds_pred.shape == (B, N_POINTS, 3), pointclouds_pred.shape

    # Check 1: tight tolerance vs a bf16-quantized reference (kernel correctness).
    ref_bf16 = _reference_bf16(images, w1, b1, w2, b2, N_POINTS)
    assert jnp.allclose(pointclouds_pred, ref_bf16, atol=1e-3, rtol=1e-2), \
        "mismatch vs bf16-quantized reference"

    # Check 2: looser tolerance vs the pure-f32 module math (bounds quantization drift).
    ref_f32 = _reference_f32(images, w1, b1, w2, b2, N_POINTS)
    assert jnp.allclose(pointclouds_pred, ref_f32, atol=2e-2, rtol=5e-2), \
        "bf16 quantization drift exceeds bound vs f32 reference"

    print("KERNEL_OK")
</pallas_src>

<mosaic_0001>
module attributes {stable_mosaic.version = 11 : i64} {
  func.func @_point_decoder_kernel(%arg0: i32, %arg1: memref<16x512xbf16, #tpu.memory_space<vmem>>, %arg2: memref<512x128xbf16, #tpu.memory_space<vmem>>, %arg3: memref<1x128xf32, #tpu.memory_space<vmem>>, %arg4: memref<128x128xbf16, #tpu.memory_space<vmem>>, %arg5: memref<1x128xf32, #tpu.memory_space<vmem>>, %arg6: memref<16x128xf32, #tpu.memory_space<vmem>>) attributes {dimension_semantics = [#tpu.dimension_semantics<parallel>], iteration_bounds = array<i64: 3>, scalar_prefetch = 0 : i64, scratch_operands = 0 : i64, tpu.core_type = #tpu.core_type<tc>, window_params = [{pipeline_mode = #tpu.pipeline_mode<synchronous>, transform_indices = @transform_0, window_bounds = array<i64: 16, 512>}, {pipeline_mode = #tpu.pipeline_mode<synchronous>, transform_indices = @transform_1, window_bounds = array<i64: 512, 128>}, {pipeline_mode = #tpu.pipeline_mode<synchronous>, transform_indices = @transform_2, window_bounds = array<i64: 1, 128>}, {transform_indices = @transform_3, window_bounds = array<i64: 128, 128>}, {transform_indices = @transform_4, window_bounds = array<i64: 1, 128>}, {transform_indices = @transform_5, window_bounds = array<i64: 16, 128>}]} {
    %c0 = arith.constant 0 : index
    %c0_0 = arith.constant 0 : index
    %0 = vector.load %arg1[%c0, %c0_0] : memref<16x512xbf16, #tpu.memory_space<vmem>>, vector<16x512xbf16>
    %c0_1 = arith.constant 0 : index
    %c0_2 = arith.constant 0 : index
    %1 = vector.load %arg2[%c0_1, %c0_2] : memref<512x128xbf16, #tpu.memory_space<vmem>>, vector<512x128xbf16>
    %cst = arith.constant dense<0.000000e+00> : vector<16x128xf32>
    %2 = tpu.matmul %0, %1, %cst {dimension_numbers = #tpu.dot_dimension_numbers<[1], [0], [0], [1], [0, 0, 1, 1], [], []>} : vector<16x512xbf16>, vector<512x128xbf16>, vector<16x128xf32> -> vector<16x128xf32>
    %c0_3 = arith.constant 0 : index
    %c0_4 = arith.constant 0 : index
    %3 = vector.load %arg3[%c0_3, %c0_4] : memref<1x128xf32, #tpu.memory_space<vmem>>, vector<1x128xf32>
    %4 = vector.broadcast %3 : vector<1x128xf32> to vector<16x128xf32>
    %5 = arith.addf %2, %4 : vector<16x128xf32>
    %cst_5 = arith.constant 0.000000e+00 : f32
    %6 = vector.broadcast %cst_5 : f32 to vector<16x128xf32>
    %7 = arith.cmpf ogt, %5, %6 : vector<16x128xf32>
    %cst_6 = arith.constant 0.00999999977 : f32
    %8 = vector.broadcast %cst_6 : f32 to vector<16x128xf32>
    %9 = arith.mulf %8, %5 : vector<16x128xf32>
    %10 = arith.select %7, %5, %9 : vector<16x128xi1>, vector<16x128xf32>
    %11 = arith.truncf %10 : vector<16x128xf32> to vector<16x128xbf16>
    %c0_7 = arith.constant 0 : index
    %c0_8 = arith.constant 0 : index
    %12 = vector.load %arg4[%c0_7, %c0_8] : memref<128x128xbf16, #tpu.memory_space<vmem>>, vector<128x128xbf16>
    %cst_9 = arith.constant dense<0.000000e+00> : vector<16x128xf32>
    %13 = tpu.matmul %11, %12, %cst_9 {dimension_numbers = #tpu.dot_dimension_numbers<[1], [0], [0], [1], [0, 0, 1, 1], [], []>} : vector<16x128xbf16>, vector<128x128xbf16>, vector<16x128xf32> -> vector<16x128xf32>
    %c0_10 = arith.constant 0 : index
    %c0_11 = arith.constant 0 : index
    %14 = vector.load %arg5[%c0_10, %c0_11] : memref<1x128xf32, #tpu.memory_space<vmem>>, vector<1x128xf32>
    %15 = vector.broadcast %14 : vector<1x128xf32> to vector<16x128xf32>
    %16 = arith.addf %13, %15 : vector<16x128xf32>
    %17 = math.tanh %16 : vector<16x128xf32>
    %c0_12 = arith.constant 0 : index
    %c0_13 = arith.constant 0 : index
    %18 = vector.load %arg6[%c0_12, %c0_13] : memref<16x128xf32, #tpu.memory_space<vmem>>, vector<16x128xf32>
    tpu.vector_store %arg6[%c0_12, %c0_13], %17 {strides = array<i32>} : memref<16x128xf32, #tpu.memory_space<vmem>>, vector<16x128xf32>,
    return
  }
  func.func @transform_0(%arg0: i32) -> (i32, i32) {
    %c0_i32 = arith.constant 0 : i32
    %c0_i32_0 = arith.constant 0 : i32
    %c0_i32_1 = arith.constant 0 : i32
    return %c0_i32, %c0_i32_0 : i32, i32
  }
  func.func @transform_1(%arg0: i32) -> (i32, i32) {
    %c0_i32 = arith.constant 0 : i32
    %c0_i32_0 = arith.constant 0 : i32
    %c0_i32_1 = arith.constant 0 : i32
    return %c0_i32, %c0_i32_0 : i32, i32
  }
  func.func @transform_2(%arg0: i32) -> (i32, i32) {
    %c0_i32 = arith.constant 0 : i32
    %c0_i32_0 = arith.constant 0 : i32
    %c0_i32_1 = arith.constant 0 : i32
    return %c0_i32, %c0_i32_0 : i32, i32
  }
  func.func @transform_3(%arg0: i32) -> (i32, i32) {
    %c0_i32 = arith.constant 0 : i32
    %c0_i32_0 = arith.constant 0 : i32
    return %c0_i32, %arg0 : i32, i32
  }
  func.func @transform_4(%arg0: i32) -> (i32, i32) {
    %c0_i32 = arith.constant 0 : i32
    %c0_i32_0 = arith.constant 0 : i32
    return %c0_i32, %arg0 : i32, i32
  }
  func.func @transform_5(%arg0: i32) -> (i32, i32) {
    %c0_i32 = arith.constant 0 : i32
    %c0_i32_0 = arith.constant 0 : i32
    return %c0_i32, %arg0 : i32, i32
  }
}

</mosaic_0001>

<bundles_post_ra>
// kernel: tpu_custom_call.1
= control target key start
LH: loop header
LB: loop body
LE: loop exit
PB: predicated region body
PF: predicated region fallthrough
CT: control target
= control target key end

     0   :  { %s1571_s0 = inlined_call_operand.hbm [shape: bf16[16,512], index: 0, kind: input, shape index: {}]   ;;  %s1572_s1 = inlined_call_operand.hbm [shape: bf16[512,128], index: 1, kind: input, shape index: {}]   ;;  %s1573_s2 = inlined_call_operand.vmem [shape: f32[1,128], index: 2, kind: input, shape index: {}]   ;;  %s1574_s3 = inlined_call_operand.hbm [shape: bf16[128,384], index: 3, kind: input, shape index: {}]   ;;  %s1575_s4 = inlined_call_operand.vmem [shape: f32[1,384], index: 4, kind: input, shape index: {}]   ;;  %s1576_s5 = inlined_call_operand.hbm [shape: f32[16,384], index: 5, kind: output, shape index: {}]  }
   0x1   :  { %1583 = sst [smem:[#allocation15_spill]] %s1571_s0 }
   0x2   :  { %10 = vsyncpa [#allocation3], 0 }
   0x3   :  { %11 = vsyncpa [#allocation6], 0 }
   0x4   :  { %12 = vsyncpa [#allocation4], 0 }
   0x5   :  { %14 = vsyncpa [#allocation4 + $0x1], 0  ;;  %s1350_s18 = smov 0   ;;  %s1352_s19 = smov 0  }
   0x6   :  { %s1354_s20 = smov 0   ;;  %s1356_s21 = smov 0  }
   0x7 LB: > { %s1371_s22 = sadd.s32 4294967295, %s1304_s21   ;;  %s890_s23 = sadd.s32 4294967294, %s1304_s21   ;;  %s1304_s21 = sphi %s1356_s21, %s1602_s21   ;;  %s1300_s20 = sphi %s1354_s20, %s1606_s20   ;;  %s1296_s19 = sphi %s1352_s19, %s1605_s19   ;;  %s1292_s18 = sphi %s1350_s18, %s1604_s18  }
   0x8   : > { %s1375_s24 = sadd.s32 1, %s1304_s21   ;;  %s90_s25 = sadd.s32 1, %s1300_s20 }
   0x9   : > { %1584 = sst [smem:[#allocation13_spill]] %s1375_s24  ;;  %s87_s26 = ssub.s32 %s1304_s21, %s1375_s24 }
   0xa   : > { %p97_p0 = scmp.ne.s32.totalorder %s1300_s20, %s1296_s19  ;;  %p88_p1 = scmp.eq.s32.totalorder %s87_s26, 0 }
   0xb   : > { %p98_p2 = scmp.eq.s32.totalorder %s1304_s21, 0  ;;  %p103_p3 = scmp.ne.s32.totalorder %s1296_s19, %s1292_s18 }
   0xc   : > { %p1578_p4 = scmp.eq.s32.totalorder %s1371_s22, 0  ;;  %p153_p7 = scmp.eq.s32.totalorder %s1371_s22, 2 }
   0xd   : > { %s1387_s27 = scalar_select %p88_p1, %s1300_s20, %s90_s25  }
   0xe   : > { %p1389_p5 = por %p98_p2, %p97_p0  ;;  %p1395_p6 = por %p1578_p4, %p103_p3 }
   0xf   : > { %1585 = sst [smem:[#allocation14_spill]] %s1387_s27  ;;  %p159_p8 = scmp.eq.s32.totalorder %s890_s23, 2 }
  0x10   : > { %s1587_s29 = scalar_select %p1395_p6, 1, 0 }
  0x11   : > { %p891_p9 = scmp.ge.s32.totalorder %s1304_s21, 1  ;;  %p166_p10 = scmp.lt.s32.totalorder %s1304_s21, 4 }
  0x12   : > { %p1402_p11 = por %p153_p7, %p97_p0  ;;  %p1406_p12 = por %p159_p8, %p103_p3 }
  0x13   : > { %p1410_p13 = pnand %p891_p9, %p166_p10  ;;  %s1306_s8 = smov [#allocation2]  }
  0x14   : > { %s1588_s30 = scalar_select %p1402_p11, 1, 0 }
  0x15   : > { %s1589_s6 = scalar_select %p1406_p12, 1, 0 }
  0x16   : > { %s1590_s7 = scalar_select %p1410_p13, 1, 0 }
  0x17   : > { %p1037_p1 = pneg %p1410_p13  ;;  %s178_s9 = sshll.u32 %s1306_s8, 4  ;;  %s179_s9 = int_to_ptr.vmem [resolvable:$true] %s178_s9 }
  0x18   : > { %p1054_p0 = scmp.lt.s32.totalorder %s1304_s21, 3  ;;  %s1307_s11 = smov [#allocation5]  }
  0x19   : > { %p1418_p2 = pnand %p1037_p1, %p1578_p4  ;;  %s191_s12 = sshll.u32 %s1307_s11, 4  ;;  %s192_s12 = int_to_ptr.vmem [resolvable:$true] %s191_s12 }
  0x1a   : > { %s1163_s13 = scalar_lea.vmem %s179_s9, 512  ;;  %p1171_p10 = scmp.lt.s32.totalorder %s179_s9, %s179_s9 }
  0x1b   : > { %p1154_p3 = pneg %p1418_p2  ;;  %p1164_p7 = scmp.ne.s32.totalorder %s179_s9, %s1163_s13 }
  0x1c   : > { %p1172_p12 = scmp.lt.s32.totalorder %s1163_s13, %s1163_s13 }
  0x1d   : > { %p1166_p8 = pnand %p1164_p7, %p1154_p3 }
  0x1e   : > { %p1173_p11 = por %p1172_p12, %p1171_p10 }
  0x1f   : > { %p1167_p9 = pneg %p1166_p8 }
  0x21   : > { %p1174_p1 = pnand %p1173_p11, %p1167_p9 }
  0x23   : > { %1177 = shalt.err (!%p1174_p1)
}
  0x24   : > { %s1308_s14 = smov 256   ;;  %s1309_s15 = smov 16  }
  0x25   : > { %s1592_s0 = sld [smem:[#allocation15_spill]]  ;;  %p1437_p7 = pnand %p1054_p0, %p1389_p5 }
  0x26   : > { %s208_s25 = sand.u32 1, %s1304_s21   ;;  %s1189_s26 = scalar_lea.vmem %s192_s12, 4096 }
  0x27   : > { %p1190_p11 = scmp.ne.s32.totalorder %s192_s12, %s1189_s26  ;;  %p1197_p9 = scmp.lt.s32.totalorder %s192_s12, %s192_s12 }
  0x28   : > { %p1198_p10 = scmp.lt.s32.totalorder %s1189_s26, %s1189_s26 }
  0x29   : > { %p1192_p12 = pnand %p1190_p11, %p1154_p3 }
  0x2a   : > { %p1199_p1 = por %p1198_p10, %p1197_p9 }
  0x2b   : > { %1040 = dma.hbm_to_vmem [thread:$0]  (!%p1418_p2), %s1592_s0, 512, %s179_s9, [#allocation3], %s1308_s14, %s1308_s14, %s1309_s15  }
  0x2c   : > { %p1193_p8 = pneg %p1192_p12 }
  0x2e   : > { %p1200_p4 = pnand %p1199_p1, %p1193_p8 }
  0x30   : > { %1203 = shalt.err (!%p1200_p4)
}
  0x31   : > { %s1310_s8 = smov 64   ;;  %s1311_s28 = smov 4  }
  0x32   : > { %1043 = dma.hbm_to_vmem [thread:$0]  (!%p1418_p2), %s1572_s1, 4096, %s192_s12, [#allocation6], %s1310_s8, %s1310_s8, %s1311_s28  }
  0x33   : > { %s210_s13 = sand.u32 1, %s1300_s20   ;;  %s896_s15 = sshll.u32 %s1304_s21, 6 }
  0x34   : > { %s895_s14 = sshll.u32 %s210_s13, 6  ;;  %s1458_s26 = scalar_lea.hbm %s1574_s3, %s896_s15 }
  0x35   : > { %s212_s0 = scalar_lea.vmem [#allocation7], %s895_s14  ;;  %s1462_s27 = scalar_lea.sflag [#allocation3], %s208_s25 }
  0x36   : > { %s218_s10 = sshll.u32 %s212_s0, 4  ;;  %s1204_s24 = scalar_lea.hbm %s1458_s26, 1024  ;;  %s1460_s10 = int_to_ptr.vmem [resolvable:$true] %s218_s10 }
  0x37   : > { %p1205_p4 = scmp.ne.s32.totalorder %s1458_s26, %s1204_s24  ;;  %p1206_p5 = pneg %p1437_p7 }
  0x38   : > { %s1209_s11 = scalar_lea.hbm %s1574_s3, 3072  ;;  %p1210_p3 = scmp.lt.s32.totalorder %s1458_s26, %s1574_s3 }
  0x39   : > { %p1207_p2 = pnand %p1206_p5, %p1205_p4  ;;  %p1211_p11 = scmp.lt.s32.totalorder %s1209_s11, %s1204_s24 }
  0x3b   : > { %p1208_p0 = pneg %p1207_p2  ;;  %p1212_p12 = por %p1211_p11, %p1210_p3 }
  0x3d   : > { %p1213_p8 = pnand %p1212_p12, %p1208_p0 }
  0x3f   : > { %1216 = shalt.err (!%p1213_p8)
}
  0x40   : > { %s1217_s0 = scalar_lea.vmem %s1460_s10, 1024  ;;  %s1312_s25 = smov [#allocation7]  }
  0x41   : > { %p1218_p9 = scmp.ne.s32.totalorder %s1460_s10, %s1217_s0  ;;  %s1222_s14 = sshll.u32 %s1312_s25, 4  ;;  %s1223_s14 = int_to_ptr.vmem [resolvable:$false] %s1222_s14 }
  0x42   : > { %s1224_s16 = scalar_lea.vmem %s1223_s14, 2048  ;;  %p1225_p4 = scmp.lt.s32.totalorder %s1460_s10, %s1223_s14 }
  0x43   : > { %p1220_p10 = pnand %p1218_p9, %p1206_p5  ;;  %p1226_p2 = scmp.lt.s32.totalorder %s1224_s16, %s1217_s0 }
  0x45   : > { %p1221_p1 = pneg %p1220_p10  ;;  %p1227_p6 = por %p1226_p2, %p1225_p4 }
  0x47   : > { %p1228_p13 = pnand %p1227_p6, %p1221_p1 }
  0x49   : > { %1231 = shalt.err (!%p1228_p13)
}
  0x4a   : > { %s1313_s24 = smov 192   ;;  %p1594_p5 = scmp.ne.s32.totalorder %s1590_s7, 0 }
  0x4b   : > { %1047 = dma.hbm_to_vmem [thread:$0]  (!%p1437_p7), %s1458_s26, 1024, %s1460_s10, %s1462_s27, %s1313_s24, %s1310_s8, %s1311_s28  }
  0x4c   : > { %236 = sbr.rel (%p1594_p5) target bundleno = 562 (0x232), region = 40  ;;  %p1595_p0 = scmp.eq.s32.totalorder (!%p1594_p5), %s1371_s22, 0 }
  0x51   : > { %1275 = dma.done.wait (%p1595_p0), [#allocation3], 512   ;;  %p1596_p3 = pmov %p1595_p0 }
  0x52   : > { %p1597_p6 = pmov %p1595_p0 }
  0x53   : > { %1277 = vsyncadd (%p1596_p3), [#allocation3], 4294966784 }
  0x54   : > { %1279 = dma.done.wait (%p1597_p6), [#allocation6], 4096   ;;  %p1598_p13 = pmov %p1595_p0 }
  0x55   : > { %s246_s23 = sand.u32 1, %s1371_s22   ;;  %s1497_s27 = sand.u32 1, %s1296_s19  }
  0x56   : > { %1281 = vsyncadd (%p1598_p13), [#allocation6], 4294963200  ;;  %s900_s7 = sshll.u32 %s1497_s27, 6  ;;  %s247_s8 = scalar_lea.sflag [#allocation3], %s246_s23 }
  0x57   : > { %s1500_s28 = scalar_lea.vmem [#allocation7], %s900_s7  ;;  %p1599_p7 = scmp.ne.s32.totalorder %s1587_s29, 0 }
  0x59   : > { %1283 = dma.done.wait (%p1599_p7), %s247_s8, 1024  }
  0x5a   : > { %1285 = vsyncadd (%p1599_p7), %s247_s8, 4294966272  ;;  %v1102_v0 = vld [vmem:[#allocation5 + $0x78] sm:$0xff]   ;;  %v1106_v4 = vld [vmem:[#allocation5 + $0x70] sm:$0xff]   ;;  %v1314_v34 = vmov 0.0   ;;  %vm1315_vm0 = vmmov 0   ;;  %p280_p11 = scmp.lt.s32.totalorder %s1371_s22, 2 }
  0x5b   : > { %v1103_v1 = vld [vmem:[#allocation5 + $0xf8] sm:$0xff]   ;;  %952 = vmatprep.subr.bf16.mxu0 %v1102_v0  ;;  %v1107_v5 = vld [vmem:[#allocation5 + $0xf0] sm:$0xff]   ;;  %v1110_v8 = vld [vmem:[#allocation5 + $0x68] sm:$0xff]   ;;  %s901_s11 = sshll.u32 %s1497_s27, 4  ;;  %s949_s13 = sshll.u32 %s1371_s22, 7 }
  0x5c   : > { %v1104_v2 = vld [vmem:[#allocation5 + $0x38] sm:$0xff]   ;;  %974 = vmatprep.subr.bf16.mxu1 %v1103_v1  ;;  %v1108_v6 = vld [vmem:[#allocation5 + $0x30] sm:$0xff]   ;;  %v1111_v9 = vld [vmem:[#allocation5 + $0xe8] sm:$0xff]   ;;  %s281_s26 = scalar_select %p280_p11, %s1371_s22, 2 }
  0x5d   : > { %v1105_v3 = vld [vmem:[#allocation5 + $0xb8] sm:$0xff]   ;;  %953 = vmatpush3.bf16.msra.mxu0 %v1104_v2  ;;  %v1109_v7 = vld [vmem:[#allocation5 + $0xb0] sm:$0xff]   ;;  %v1112_v10 = vld [vmem:[#allocation5 + $0x28] sm:$0xff]   ;;  %s279_s15 = scalar_lea.vmem [#allocation8], %s901_s11  ;;  %s1527_s16 = scalar_lea.hbm %s1576_s5, %s949_s13 }
  0x5e   : > { %975 = vmatpush3.bf16.msra.mxu1 %v1105_v3  ;;  %954 = vmatprep.subr.bf16.mxu0 %v1106_v4  ;;  %v1113_v11 = vld [vmem:[#allocation5 + $0xa8] sm:$0xff]   ;;  %v1114_v12 = vld [vmem:[#allocation5 + $0x60] sm:$0xff]   ;;  %v1118_v16 = vld [vmem:[#allocation5 + $0x58] sm:$0xff]   ;;  %s282_s9 = scalar_lea.vmem %s1575_s4, %s281_s26  ;;  %s789_s0 = sshll.u32 %s279_s15, 4  ;;  %s1529_s0 = int_to_ptr.vmem [resolvable:$true] %s789_s0 }
  0x5f   : > { %976 = vmatprep.subr.bf16.mxu1 %v1107_v5  ;;  %v1115_v13 = vld [vmem:[#allocation5 + $0xe0] sm:$0xff]   ;;  %v1119_v17 = vld [vmem:[#allocation5 + $0xd8] sm:$0xff]   ;;  %v1122_v20 = vld [vmem:[#allocation5 + $0x50] sm:$0xff]   ;;  %s777_s24 = scalar_lea.sflag [#allocation4], %s1497_s27  ;;  %s1232_s23 = scalar_lea.vmem %s1529_s0, 256 }
  0x60   : > { %v1116_v14 = vld [vmem:[#allocation5 + $0x20] sm:$0xff]   ;;  %v1120_v18 = vld [vmem:[#allocation5 + $0x18] sm:$0xff]   ;;  %v1123_v21 = vld [vmem:[#allocation5 + $0xd0] sm:$0xff]   ;;  %p1233_p12 = scmp.ne.s32.totalorder %s1529_s0, %s1232_s23  ;;  %p1600_p8 = scmp.ne.s32.totalorder %s1588_s30, 0 }
  0x61   : > { %955 = vmatpush3.bf16.msra.mxu0 %v1108_v6  ;;  %v1117_v15 = vld [vmem:[#allocation5 + $0xa0] sm:$0xff]   ;;  %v1121_v19 = vld [vmem:[#allocation5 + $0x98] sm:$0xff]   ;;  %v1124_v22 = vld [vmem:[#allocation5 + $0x10] sm:$0xff]   ;;  %s1316_s22 = smov [#allocation8]  }
  0x62   : > { %977 = vmatpush3.bf16.msra.mxu1 %v1109_v7  ;;  %956 = vmatprep.subr.bf16.mxu0 %v1110_v8  ;;  %v1125_v23 = vld [vmem:[#allocation5 + $0x90] sm:$0xff]   ;;  %v1126_v24 = vld [vmem:[#allocation5 + $0x48] sm:$0xff]   ;;  %v1130_v28 = vld [vmem:[#allocation5 + $0x40] sm:$0xff]   ;;  %p1234_p9 = pnand %p1233_p12, %p1600_p8  ;;  %s1236_s7 = sshll.u32 %s1316_s22, 4  ;;  %s1237_s7 = int_to_ptr.vmem [resolvable:$false] %s1236_s7 }
  0x63   : > { %978 = vmatprep.subr.bf16.mxu1 %v1111_v9  ;;  %v1127_v25 = vld [vmem:[#allocation5 + $0xc8] sm:$0xff]   ;;  %v1131_v29 = vld [vmem:[#allocation5 + $0xc0] sm:$0xff]   ;;  %v1140_v37 = vld [vmem:[%s1500_s28 + $0x38] sm:$0xff]   ;;  %s1238_s8 = scalar_lea.vmem %s1237_s7, 512  ;;  %p1239_p1 = scmp.lt.s32.totalorder %s1529_s0, %s1237_s7 }
  0x64   : > { %v1128_v26 = vld [vmem:[#allocation5 + $0x8] sm:$0xff]   ;;  %v1132_v30 = vld [vmem:[#allocation5] sm:$0xff]   ;;  %v1141_v38 = vld [vmem:[%s1500_s28 + $0x30] sm:$0xff]   ;;  %p1235_p10 = pneg %p1234_p9  ;;  %p1240_p4 = scmp.lt.s32.totalorder %s1238_s8, %s1232_s23 }
  0x65   : > { %957 = vmatpush3.bf16.msra.mxu0 %v1112_v10  ;;  %v1129_v27 = vld [vmem:[#allocation5 + $0x88] sm:$0xff]   ;;  %v1133_v31 = vld [vmem:[#allocation5 + $0x80] sm:$0xff]   ;;  %v1144_v41 = vld [vmem:[%s1500_s28 + $0x18] sm:$0xff]  }
  0x66   : > { %979 = vmatpush3.bf16.msra.mxu1 %v1113_v11  ;;  %958 = vmatprep.subr.bf16.mxu0 %v1114_v12  ;;  %v1134_v32 = vld [vmem:[#allocation2] ss:$16 sps:$4 sm:$0xff]   ;;  %v1136_v33 = vld [vmem:[#allocation2 + $0x4] ss:$16 sps:$4 sm:$0xff]   ;;  %v1137_v35 = vld [vmem:[#allocation2 + $0x8] ss:$16 sps:$4 sm:$0xff]   ;;  %p1241_p2 = por %p1240_p4, %p1239_p1 }
  0x67   : > { %980 = vmatprep.subr.bf16.mxu1 %v1115_v13  ;;  %v1139_v36 = vld [vmem:[#allocation2 + $0xc] ss:$16 sps:$4 sm:$0xff]   ;;  %603 = vmatprep.mubr.bf16.mxu0 %v1136_v33  ;;  %v1143_v40 = vld [vmem:[%s1500_s28 + $0x20] sm:$0xff]   ;;  %v1145_v42 = vld [vmem:[%s1500_s28 + $0x10] sm:$0xff]  }
  0x68   : > { %644 = vmatprep.mubr.bf16.mxu1 %v1139_v36  ;;  %v1142_v39 = vld [vmem:[%s1500_s28 + $0x28] sm:$0xff]   ;;  %v1147_v44 = vld [vmem:[%s1500_s28] sm:$0xff]   ;;  %p1242_p5 = pnand %p1241_p2, %p1235_p10 }
  0x69   : > { %959 = vmatpush3.bf16.msra.mxu0 %v1116_v14  ;;  %v1146_v43 = vld [vmem:[%s1500_s28 + $0x8] sm:$0xff]   ;;  %v902_v47 = vld [vmem:[%s1573_s2] ss:$0 sm:$0xff] }
  0x6a   : > { %981 = vmatpush3.bf16.msra.mxu1 %v1117_v15  ;;  %960 = vmatprep.subr.bf16.mxu0 %v1118_v16  ;;  %v939_v3 = vld [vmem:[%s282_s9] ss:$0 sm:$0xff] }
  0x6b   : > { %982 = vmatprep.subr.bf16.mxu1 %v1119_v17 }
  0x6d   : > { %961 = vmatpush3.bf16.msra.mxu0 %v1120_v18 }
  0x6e   : > { %983 = vmatpush3.bf16.msra.mxu1 %v1121_v19  ;;  %962 = vmatprep.subr.bf16.mxu0 %v1122_v20 }
  0x6f   : > { %984 = vmatprep.subr.bf16.mxu1 %v1123_v21 }
  0x71   : > { %963 = vmatpush3.bf16.msra.mxu0 %v1124_v22 }
  0x72   : > { %985 = vmatpush3.bf16.msra.mxu1 %v1125_v23  ;;  %964 = vmatprep.subr.bf16.mxu0 %v1126_v24 }
  0x73   : > { %986 = vmatprep.subr.bf16.mxu1 %v1127_v25 }
  0x75   : > { %965 = vmatpush3.bf16.msra.mxu0 %v1128_v26 }
  0x76   : > { %987 = vmatpush3.bf16.msra.mxu1 %v1129_v27  ;;  %966 = vmatprep.subr.bf16.mxu0 %v1130_v28 }
  0x77   : > { %988 = vmatprep.subr.bf16.mxu1 %v1131_v29 }
  0x79   : > { %967 = vmatpush3.bf16.msra.mxu0 %v1132_v30 }
  0x7a   : > { %989 = vmatpush3.bf16.msra.mxu1 %v1133_v31  ;;  %1005 = vmatprep.subr.bf16.mxu0 %v1314_v34 }
  0x7c   : > { %604 = vmatmul.mubr.bf16.vlgmr.msra.gmra.mxu0 %v1134_v32 }
  0x7d   : > { %645 = vmatmul.mubr.bf16.vlgmr.msra.gmra.mxu1 %v1137_v35  ;;  %1006 = vmatpush3.bf16.msra.mxu0 %v1140_v37 }
  0x7e   : > { %1007 = vmatprep.subr.bf16.mxu0 %v1314_v34  ;;  %1021 = vmatprep.mubr.msk.bf16.mxu0 %vm1315_vm0, %v1314_v34 }
  0x81   : > { %1008 = vmatpush3.bf16.msra.mxu0 %v1141_v38 }
  0x82   : > { %1009 = vmatprep.subr.bf16.mxu0 %v1314_v34 }
  0x85   : > { %1010 = vmatpush3.bf16.msra.mxu0 %v1142_v39 }
  0x86   : > { %1011 = vmatprep.subr.bf16.mxu0 %v1314_v34 }
  0x89   : > { %1012 = vmatpush3.bf16.msra.mxu0 %v1143_v40 }
  0x8a   : > { %1013 = vmatprep.subr.bf16.mxu0 %v1314_v34 }
  0x8d   : > { %1014 = vmatpush3.bf16.msra.mxu0 %v1144_v41 }
  0x8e   : > { %1015 = vmatprep.subr.bf16.mxu0 %v1314_v34 }
  0x91   : > { %1016 = vmatpush3.bf16.msra.mxu0 %v1145_v42 }
  0x92   : > { %1017 = vmatprep.subr.bf16.mxu0 %v1314_v34 }
  0x95   : > { %1018 = vmatpush3.bf16.msra.mxu0 %v1146_v43 }
  0x96   : > { %1019 = vmatprep.subr.bf16.mxu0 %v1314_v34 }
  0x99   : > { %1020 = vmatpush3.bf16.msra.mxu0 %v1147_v44 }
 0x13c   : > { %v968_v45 = vpop.f32.mrf.mxu0 }
 0x13d   : > { %v990_v46 = vpop.f32.mrf.mxu1 }
 0x13e   : > { %v969_v48 = vpop.f32.mrf.mxu0 }
 0x13f   : > { %v970_v49 = vadd.f32 %v969_v48, %v968_v45  ;;  %v991_v50 = vpop.f32.mrf.mxu1 }
 0x140   : > { %v971_v51 = vpop.f32.mrf.mxu0  ;;  %v992_v53 = vadd.f32 %v991_v50, %v990_v46 }
 0x141   : > { %v606_v52 = vadd.f32 %v970_v49, %v902_v47  ;;  %v993_v54 = vpop.f32.mrf.mxu1 }
 0x142   : > { %v972_v55 = vpop.f32.mrf.mxu0 }
 0x143   : > { %v647_v56 = vadd.f32 %v992_v53, %v606_v52  ;;  %v973_v57 = vadd.f32 %v972_v55, %v971_v51  ;;  %v994_v58 = vpop.f32.mrf.mxu1 }
 0x144   : > { %v995_v60 = vadd.f32 %v994_v58, %v993_v54 }
 0x145   : > { %v609_v59 = vadd.f32 %v973_v57, %v902_v47  ;;  %v655_v61 = vmul.f32 0.01, %v647_v56  ;;  %vm653_vm1 = vcmp.gt.f32.partialorder %v647_v56, 0.0 }
 0x147   : > { %v650_v62 = vadd.f32 %v995_v60, %v609_v59  ;;  %v657_v0 = vsel %vm653_vm1, %v647_v56, %v655_v61 }
 0x149   : > { %vm654_vm2 = vcmp.gt.f32.partialorder %v650_v62, 0.0  ;;  %v656_v63 = vmul.f32 0.01, %v650_v62 }
 0x14b   : > { %v658_v1 = vsel %vm654_vm2, %v650_v62, %v656_v63 }
 0x14c   : > { %v659_v2 = vpack.c.bf16 %v658_v1, %v657_v0 }
 0x14e   : > { %1022 = vmatmul.mubr.bf16.vlgmr.msra.gmra.mxu0 %v659_v2 }
 0x20e   : > { %v765_v4 = vpop.f32.mrf.mxu0 }
 0x20f   : > { %v766_v5 = vadd.f32 %v939_v3, %v765_v4 }
 0x210   : > { %v1023_v6 = vpop.f32.mrf.mxu0 }
 0x211   : > { %1148 = vtanh.f32 %v766_v5 }
 0x212   : > { %v768_v7 = vpop.f32.mrf.mxu0 }
 0x213   : > { %v769_v8 = vadd.f32 %v939_v3, %v768_v7 }
 0x214   : > { %v1024_v9 = vpop.f32.mrf.mxu0 }
 0x215   : > { %1150 = vtanh.f32 %v769_v8 }
 0x21e   : > { %v1149_v10 = vpop.eup %1148 }
 0x21f   : > { %774 = vst [vmem:[%s279_s15] sm:$0xff] %v1149_v10 }
 0x222   : > { %v1151_v11 = vpop.eup %1150 }
 0x223   : > { %775 = vst [vmem:[%s279_s15 + $0x8] sm:$0xff] %v1151_v11 }
 0x224   : > { %1245 = shalt.err (!%p1242_p5)
}
 0x225   : > { %s1246_s28 = scalar_lea.hbm %s1527_s16, 256  ;;  %s1250_s26 = scalar_lea.hbm %s1576_s5, 768 }
 0x226   : > { %p1247_p0 = scmp.ne.s32.totalorder %s1527_s16, %s1246_s28  ;;  %p1251_p13 = scmp.lt.s32.totalorder %s1527_s16, %s1576_s5 }
 0x227   : > { %p1252_p7 = scmp.lt.s32.totalorder %s1250_s26, %s1246_s28 }
 0x228   : > { %p1248_p3 = pnand %p1247_p0, %p1600_p8 }
 0x229   : > { %p1253_p11 = por %p1252_p7, %p1251_p13 }
 0x22a   : > { %p1249_p6 = pneg %p1248_p3 }
 0x22c   : > { %p1254_p12 = pnand %p1253_p11, %p1249_p6 }
 0x22e   : > { %1257 = shalt.err (!%p1254_p12)
}
 0x22f   : > { %s1317_s9 = smov 128   ;;  %s1318_s11 = smov 384  }
 0x230   : > { %s1319_s13 = smov 8  }
 0x231   : > { %1035 = dma.vmem_to_hbm [thread:$0]  (%p1600_p8), %s1529_s0, 256, %s1527_s16, %s777_s24, %s1317_s9, %s1318_s11, %s1319_s13  }
 0x232 PF: > { %p1057_p9 = scmp.ge.s32.totalorder %s1304_s21, 2  ;;  %s804_s15 = sand.u32 1, %s1292_s18  }
 0x233   : > { %p1601_p10 = scmp.ne.s32.totalorder %s1589_s6, 0  ;;  %s805_s25 = scalar_lea.sflag [#allocation4], %s804_s15 }
 0x235   : > { %p1049_p1 = pnand %p1057_p9, %p1601_p10 }
 0x237   : > { %p1050_p4 = pneg %p1049_p1 }
 0x239   : > { %1287 = dma.done.wait (%p1050_p4), %s805_s25, 256  }
 0x23a   : > { %1289 = vsyncadd (%p1050_p4), %s805_s25, 4294967040  ;;  %s1602_s21 = sld [smem:[#allocation13_spill]]  ;;  %s1604_s18 = smov %s1296_s19 }
 0x23b   : > { %s1603_s14 = sld [smem:[#allocation14_spill]]  ;;  %s1605_s19 = smov %s1300_s20 }
 0x240   : > { %p17_p2 = scmp.ge.s32.totalorder %s1602_s21, 5  }
 0x241   : > { %s1606_s20 = smov %s1603_s14 }
 0x242   :  { %19 = sbr.rel (!%p17_p2) target bundleno = 7 (0x7), region = 95 }
 0x247   :  { %810 = vsyncpa [#allocation3], 1 }
 0x248   :  { %812 = vsyncpa [#allocation3 + $0x1], 1 }
 0x249   :  { %813 = vsyncpa [#allocation6], 1 }
 0x24a   :  { %814 = vsyncpa [#allocation4], 1 }
 0x24b   :  { %816 = vsyncpa [#allocation4 + $0x1], 1 }

</bundles_post_ra>
